<compile_context>
chip_gen: v7x
topology: tpu7x:2x2x1
jax: 0.10.0
libtpu: 0.0.40
codegen_flags: <defaults>
</compile_context>

<pallas_src>
import math

import jax
import jax.numpy as jnp
from jax.experimental import pallas as pl
from jax.experimental.pallas import tpu as pltpu

PHI = (1.0 + math.sqrt(5.0)) / 2.0
LN_EPS = 1e-5  # torch.nn.LayerNorm default


def _round_up(n, m):
    return ((n + m - 1) // m) * m


def _layernorm(v, gamma, beta):
    # One-pass E[x^2] - E[x]^2 form: two back-to-back cross-lane reductions.
    inv_d = 1.0 / v.shape[-1]
    s1 = jnp.sum(v, axis=-1, keepdims=True)
    s2 = jnp.sum(v * v, axis=-1, keepdims=True)
    mean = s1 * inv_d
    var = s2 * inv_d - mean * mean
    return (v - mean) * jax.lax.rsqrt(var + LN_EPS) * gamma + beta


def quantum_state_kernel(
    x_ref,      # (TILE_R, D)   input rows (io dtype)
    w_ref,      # (D, 2D)       [wg^T + I | we^T + I] fused weight (io dtype)
    b_ref,      # (1, 2D)       [bg | be] fused bias (f32)
    p_ref,      # (6, D)        0: cos(phase) 1: sin(phase)
                #               2: in_gamma 3: in_beta 4: out_gamma 5: out_beta
    out_ref,    # (TILE_R, 2D)  [combined_real | combined_imag] (io dtype)
):
    D = x_ref.shape[-1]

    cosp = p_ref[0:1, :]
    sinp = p_ref[1:2, :]
    ig = p_ref[2:3, :]
    ib = p_ref[3:4, :]
    og = p_ref[4:5, :]
    ob = p_ref[5:6, :]

    x = x_ref[...].astype(jnp.float32)

    # Input LayerNorm (f32), then the 0.01 scale.
    xn = _layernorm(x, ig, ib) * 0.01

    # One fused matmul produces [ground | excited]; residual identity and
    # biases are folded into w_ref / b_ref, so xn dies right after the dot.
    ge = jnp.dot(xn.astype(w_ref.dtype), w_ref[...],
                 preferred_element_type=jnp.float32) + b_ref[...]
    ground = ge[:, :D]
    excited = ge[:, D:]

    combined_real = ground + excited * cosp
    combined_imag = excited * sinp

    inv_norm = jax.lax.rsqrt(
        combined_real * combined_real + combined_imag * combined_imag + 1e-8)
    combined_real = combined_real * inv_norm
    combined_imag = combined_imag * inv_norm

    out_ref[:, :D] = _layernorm(combined_real, og, ob).astype(out_ref.dtype)
    out_ref[:, D:] = _layernorm(combined_imag, og, ob).astype(out_ref.dtype)


def simple_quantum_state_forward(x, params, *, max_tile_rows=4096):
    """x: (B, S, D) or (S, D). Returns (combined_real, combined_imag)."""
    if x.ndim == 2:
        x = x[None]  # matches torch unsqueeze(0)
    B, S, D = x.shape
    rows = B * S

    # I/O dtype follows the caller (bf16 fast path); math stays f32 in-kernel.
    if x.dtype == jnp.dtype(jnp.bfloat16):
        io_dtype = jnp.bfloat16
    else:
        io_dtype = jnp.float32
    io_bytes = jnp.dtype(io_dtype).itemsize

    xf = x.reshape(rows, D)
    if xf.dtype != jnp.dtype(io_dtype):
        xf = xf.astype(io_dtype)

    # Fused (D, 2D) weight with the "+ x" residual folded in, and fused bias.
    eye = jnp.eye(D, dtype=jnp.float32)
    w_fused = jnp.concatenate(
        [params["wg"].astype(jnp.float32).T + eye,
         params["we"].astype(jnp.float32).T + eye], axis=1).astype(io_dtype)
    b_fused = jnp.concatenate(
        [params["bg"], params["be"]]).astype(jnp.float32).reshape(1, 2 * D)

    # Hoist the loop-invariant transcendentals out of the kernel.
    phase = jnp.tanh(params["phase"].astype(jnp.float32)) * (PHI * 0.01)
    param_pack = jnp.stack(
        [jnp.cos(phase), jnp.sin(phase),
         params["in_gamma"], params["in_beta"],
         params["out_gamma"], params["out_beta"]],
        axis=0).astype(jnp.float32)                      # (6, D)

    # Row-tile granularity: 8 sublanes for f32, 16 for packed bf16.
    mult = 16 if io_dtype == jnp.bfloat16 else 8

    padded_rows = rows
    if rows < mult:  # tiny inputs only; no full-array pad in the common case
        padded_rows = mult
        xf = jnp.pad(xf, ((0, padded_rows - rows), (0, 0)))

    # Generation-aware VMEM capacity (v7x: 64 MiB, v5e/v6e: 128 MiB).
    try:
        vmem_cap = int(pltpu.get_tpu_info().vmem_capacity_bytes)
    except Exception:
        vmem_cap = 64 << 20
    vmem_cap = int(min(max(vmem_cap, 32 << 20), 128 << 20))

    # Resident (grid-invariant, single-buffered): fused weight + bias + params.
    resident = 2 * D * D * io_bytes + 2 * D * 4 + 6 * D * 4
    # Per-row: double-buffered x tile + double-buffered out tile (io dtype)
    # plus ~6 lane-rows of (2D) f32 intermediates (ge, real/imag, inv_norm,
    # LayerNorm temporaries).
    per_row = 2 * D * io_bytes + 4 * D * io_bytes + 6 * (2 * D) * 4

    headroom = 6 << 20
    avail = max(vmem_cap - headroom - resident, 2 << 20)
    vmem_tile = max(mult, int(avail // per_row))

    # Keep >= 2 grid steps when rows permit (v7x megacore: 2 TensorCores),
    # and never let the block exceed the (padded) row count.
    two_step_cap = max(mult, _round_up(pl.cdiv(padded_rows, 2), mult))
    full_cap = max(mult, (padded_rows // mult) * mult)
    tile = min(vmem_tile, two_step_cap, full_cap, int(max_tile_rows))
    tile = max(mult, (tile // mult) * mult)
    grid = pl.cdiv(padded_rows, tile)

    need = resident + tile * per_row
    vmem_limit = int(min(max(need + (4 << 20), 32 << 20), vmem_cap - (2 << 20)))
    vmem_limit = max(vmem_limit, 16 << 20)

    def _call(single_buffer_invariants):
        def inv_spec(shape):
            if single_buffer_invariants:
                return pl.BlockSpec(shape, lambda i: (0, 0),
                                    pipeline_mode=pl.Buffered(1))
            return pl.BlockSpec(shape, lambda i: (0, 0))

        return pl.pallas_call(
            quantum_state_kernel,
            out_shape=jax.ShapeDtypeStruct((padded_rows, 2 * D), io_dtype),
            grid_spec=pltpu.PrefetchScalarGridSpec(
                num_scalar_prefetch=0,
                grid=(grid,),
                in_specs=[
                    pl.BlockSpec((tile, D), lambda i: (i, 0)),   # x rows
                    inv_spec((D, 2 * D)),                        # fused weight
                    inv_spec((1, 2 * D)),                        # fused bias
                    inv_spec((6, D)),                            # param pack
                ],
                out_specs=pl.BlockSpec((tile, 2 * D), lambda i: (i, 0)),
            ),
            compiler_params=pltpu.CompilerParams(
                dimension_semantics=("parallel",),
                vmem_limit_bytes=vmem_limit,
            ),
        )(xf, w_fused, b_fused, param_pack)

    if hasattr(pl, "Buffered"):
        try:
            out = _call(True)
            out = jax.block_until_ready(out)
        except Exception:
            # Fallback: default double-buffered invariants (always supported).
            out = _call(False)
    else:
        out = _call(False)

    real = out[:rows, :D].reshape(B, S, D)
    imag = out[:rows, D:].reshape(B, S, D)
    return real, imag


def init_params(key, dim):
    """Deterministic parameter init matching the PyTorch module's __init__."""
    k_wg, k_we, k_phase = jax.random.split(key, 3)
    # xavier_normal_ with gain=0.01: std = gain * sqrt(2 / (fan_in + fan_out))
    std = 0.01 * math.sqrt(2.0 / (dim + dim))
    return {
        "wg": jax.random.normal(k_wg, (dim, dim), jnp.float32) * std,   # (out, in)
        "bg": jnp.zeros((dim,), jnp.float32),
        "we": jax.random.normal(k_we, (dim, dim), jnp.float32) * std,   # (out, in)
        "be": jnp.zeros((dim,), jnp.float32),
        "phase": jax.random.normal(k_phase, (dim,), jnp.float32) * 0.001,
        "in_gamma": jnp.ones((dim,), jnp.float32),
        "in_beta": jnp.zeros((dim,), jnp.float32),
        "out_gamma": jnp.ones((dim,), jnp.float32),
        "out_beta": jnp.zeros((dim,), jnp.float32),
    }


def _reference(x, params):
    """Pure-JAX reference of the PyTorch forward (non-mps branch)."""
    def ln(v, g, b):
        m = jnp.mean(v, axis=-1, keepdims=True)
        var = jnp.mean((v - m) ** 2, axis=-1, keepdims=True)
        return (v - m) / jnp.sqrt(var + LN_EPS) * g + b

    xn = ln(x, params["in_gamma"], params["in_beta"]) * 0.01
    ground = xn @ params["wg"].T + params["bg"] + xn
    excited = xn @ params["we"].T + params["be"] + xn
    phase = jnp.tanh(params["phase"]) * PHI * 0.01
    real = ground + excited * jnp.cos(phase)
    imag = excited * jnp.sin(phase)
    norm = jnp.sqrt(real**2 + imag**2 + 1e-8)
    real, imag = real / norm, imag / norm
    return (ln(real, params["out_gamma"], params["out_beta"]),
            ln(imag, params["out_gamma"], params["out_beta"]))


if __name__ == "__main__":
    B, S, D = 2, 8, 32
    key = jax.random.PRNGKey(0)
    k_x, k_p = jax.random.split(key)

    x = jax.random.normal(k_x, (B, S, D), jnp.float32)
    params = init_params(k_p, D)

    # f32 path: bit-for-bit comparable with the PyTorch/JAX reference.
    real, imag = simple_quantum_state_forward(x, params)
    jax.block_until_ready((real, imag))

    ref_real, ref_imag = _reference(x, params)
    assert real.shape == (B, S, D) and imag.shape == (B, S, D)
    assert jnp.allclose(real, ref_real, atol=1e-4, rtol=1e-4), "real mismatch"
    assert jnp.allclose(imag, ref_imag, atol=1e-4, rtol=1e-4), "imag mismatch"

    # bf16 fast path (halved HBM traffic, bf16 MXU): smoke test only — math
    # stays f32 in-kernel, but bf16 I/O truncation makes tight comparison
    # against the f32 reference inappropriate.
    x_bf16 = x.astype(jnp.bfloat16)
    real_b, imag_b = simple_quantum_state_forward(x_bf16, params)
    jax.block_until_ready((real_b, imag_b))
    assert real_b.shape == (B, S, D) and imag_b.shape == (B, S, D)
    assert real_b.dtype == jnp.bfloat16 and imag_b.dtype == jnp.bfloat16
    assert bool(jnp.all(jnp.isfinite(real_b.astype(jnp.float32))))
    assert bool(jnp.all(jnp.isfinite(imag_b.astype(jnp.float32))))

    print("KERNEL_OK")
</pallas_src>

<mosaic_0001>
module attributes {stable_mosaic.version = 11 : i64} {
  func.func @quantum_state_kernel(%arg0: i32, %arg1: memref<8x32xf32, #tpu.memory_space<vmem>>, %arg2: memref<32x64xf32, #tpu.memory_space<vmem>>, %arg3: memref<1x64xf32, #tpu.memory_space<vmem>>, %arg4: memref<6x32xf32, #tpu.memory_space<vmem>>, %arg5: memref<8x64xf32, #tpu.memory_space<vmem>>) attributes {dimension_semantics = [#tpu.dimension_semantics<parallel>], iteration_bounds = array<i64: 2>, scalar_prefetch = 0 : i64, scratch_operands = 0 : i64, tpu.core_type = #tpu.core_type<tc>, window_params = [{transform_indices = @transform_0, window_bounds = array<i64: 8, 32>}, {pipeline_mode = #tpu.pipeline_mode<synchronous>, transform_indices = @transform_1, window_bounds = array<i64: 32, 64>}, {pipeline_mode = #tpu.pipeline_mode<synchronous>, transform_indices = @transform_2, window_bounds = array<i64: 1, 64>}, {pipeline_mode = #tpu.pipeline_mode<synchronous>, transform_indices = @transform_3, window_bounds = array<i64: 6, 32>}, {transform_indices = @transform_4, window_bounds = array<i64: 8, 64>}]} {
    %c0 = arith.constant 0 : index
    %c0_0 = arith.constant 0 : index
    %0 = vector.load %arg4[%c0, %c0_0] : memref<6x32xf32, #tpu.memory_space<vmem>>, vector<1x32xf32>
    %c1 = arith.constant 1 : index
    %c0_1 = arith.constant 0 : index
    %1 = vector.load %arg4[%c1, %c0_1] : memref<6x32xf32, #tpu.memory_space<vmem>>, vector<1x32xf32>
    %c2 = arith.constant 2 : index
    %c0_2 = arith.constant 0 : index
    %2 = vector.load %arg4[%c2, %c0_2] : memref<6x32xf32, #tpu.memory_space<vmem>>, vector<1x32xf32>
    %c3 = arith.constant 3 : index
    %c0_3 = arith.constant 0 : index
    %3 = vector.load %arg4[%c3, %c0_3] : memref<6x32xf32, #tpu.memory_space<vmem>>, vector<1x32xf32>
    %c4 = arith.constant 4 : index
    %c0_4 = arith.constant 0 : index
    %4 = vector.load %arg4[%c4, %c0_4] : memref<6x32xf32, #tpu.memory_space<vmem>>, vector<1x32xf32>
    %c5 = arith.constant 5 : index
    %c0_5 = arith.constant 0 : index
    %5 = vector.load %arg4[%c5, %c0_5] : memref<6x32xf32, #tpu.memory_space<vmem>>, vector<1x32xf32>
    %c0_6 = arith.constant 0 : index
    %c0_7 = arith.constant 0 : index
    %6 = vector.load %arg1[%c0_6, %c0_7] : memref<8x32xf32, #tpu.memory_space<vmem>>, vector<8x32xf32>
    %cst = arith.constant dense<0.000000e+00> : vector<8xf32>
    %7 = vector.multi_reduction <add>, %6, %cst [1] : vector<8x32xf32> to vector<8xf32>
    %8 = vector.shape_cast %7 : vector<8xf32> to vector<8x1xf32>
    %9 = arith.mulf %6, %6 : vector<8x32xf32>
    %cst_8 = arith.constant dense<0.000000e+00> : vector<8xf32>
    %10 = vector.multi_reduction <add>, %9, %cst_8 [1] : vector<8x32xf32> to vector<8xf32>
    %11 = vector.shape_cast %10 : vector<8xf32> to vector<8x1xf32>
    %cst_9 = arith.constant 3.125000e-02 : f32
    %12 = vector.broadcast %cst_9 : f32 to vector<8x1xf32>
    %13 = arith.mulf %8, %12 : vector<8x1xf32>
    %cst_10 = arith.constant 3.125000e-02 : f32
    %14 = vector.broadcast %cst_10 : f32 to vector<8x1xf32>
    %15 = arith.mulf %11, %14 : vector<8x1xf32>
    %16 = arith.mulf %13, %13 : vector<8x1xf32>
    %17 = arith.subf %15, %16 : vector<8x1xf32>
    %18 = vector.broadcast %13 : vector<8x1xf32> to vector<8x32xf32>
    %19 = arith.subf %6, %18 : vector<8x32xf32>
    %cst_11 = arith.constant 9.99999974E-6 : f32
    %20 = vector.broadcast %cst_11 : f32 to vector<8x1xf32>
    %21 = arith.addf %17, %20 : vector<8x1xf32>
    %22 = math.rsqrt %21 : vector<8x1xf32>
    %23 = vector.broadcast %22 : vector<8x1xf32> to vector<8x32xf32>
    %24 = arith.mulf %19, %23 : vector<8x32xf32>
    %25 = vector.broadcast %2 : vector<1x32xf32> to vector<8x32xf32>
    %26 = arith.mulf %24, %25 : vector<8x32xf32>
    %27 = vector.broadcast %3 : vector<1x32xf32> to vector<8x32xf32>
    %28 = arith.addf %26, %27 : vector<8x32xf32>
    %cst_12 = arith.constant 0.00999999977 : f32
    %29 = vector.broadcast %cst_12 : f32 to vector<8x32xf32>
    %30 = arith.mulf %28, %29 : vector<8x32xf32>
    %c0_13 = arith.constant 0 : index
    %c0_14 = arith.constant 0 : index
    %31 = vector.load %arg2[%c0_13, %c0_14] : memref<32x64xf32, #tpu.memory_space<vmem>>, vector<32x64xf32>
    %cst_15 = arith.constant dense<0.000000e+00> : vector<8x64xf32>
    %32 = tpu.matmul %30, %31, %cst_15 {dimension_numbers = #tpu.dot_dimension_numbers<[1], [0], [0], [1], [0, 0, 1, 1], [], []>} : vector<8x32xf32>, vector<32x64xf32>, vector<8x64xf32> -> vector<8x64xf32>
    %c0_16 = arith.constant 0 : index
    %c0_17 = arith.constant 0 : index
    %33 = vector.load %arg3[%c0_16, %c0_17] : memref<1x64xf32, #tpu.memory_space<vmem>>, vector<1x64xf32>
    %34 = vector.broadcast %33 : vector<1x64xf32> to vector<8x64xf32>
    %35 = arith.addf %32, %34 : vector<8x64xf32>
    %36 = vector.extract_strided_slice %35 {offsets = [0, 0], sizes = [8, 32], strides = [1, 1]} : vector<8x64xf32> to vector<8x32xf32>
    %37 = vector.extract_strided_slice %35 {offsets = [0, 32], sizes = [8, 32], strides = [1, 1]} : vector<8x64xf32> to vector<8x32xf32>
    %38 = vector.broadcast %0 : vector<1x32xf32> to vector<8x32xf32>
    %39 = arith.mulf %37, %38 : vector<8x32xf32>
    %40 = arith.addf %36, %39 : vector<8x32xf32>
    %41 = vector.broadcast %1 : vector<1x32xf32> to vector<8x32xf32>
    %42 = arith.mulf %37, %41 : vector<8x32xf32>
    %43 = arith.mulf %40, %40 : vector<8x32xf32>
    %44 = arith.mulf %42, %42 : vector<8x32xf32>
    %45 = arith.addf %43, %44 : vector<8x32xf32>
    %cst_18 = arith.constant 9.99999993E-9 : f32
    %46 = vector.broadcast %cst_18 : f32 to vector<8x32xf32>
    %47 = arith.addf %45, %46 : vector<8x32xf32>
    %48 = math.rsqrt %47 : vector<8x32xf32>
    %49 = arith.mulf %40, %48 : vector<8x32xf32>
    %50 = arith.mulf %42, %48 : vector<8x32xf32>
    %cst_19 = arith.constant dense<0.000000e+00> : vector<8xf32>
    %51 = vector.multi_reduction <add>, %49, %cst_19 [1] : vector<8x32xf32> to vector<8xf32>
    %52 = vector.shape_cast %51 : vector<8xf32> to vector<8x1xf32>
    %53 = arith.mulf %49, %49 : vector<8x32xf32>
    %cst_20 = arith.constant dense<0.000000e+00> : vector<8xf32>
    %54 = vector.multi_reduction <add>, %53, %cst_20 [1] : vector<8x32xf32> to vector<8xf32>
    %55 = vector.shape_cast %54 : vector<8xf32> to vector<8x1xf32>
    %cst_21 = arith.constant 3.125000e-02 : f32
    %56 = vector.broadcast %cst_21 : f32 to vector<8x1xf32>
    %57 = arith.mulf %52, %56 : vector<8x1xf32>
    %cst_22 = arith.constant 3.125000e-02 : f32
    %58 = vector.broadcast %cst_22 : f32 to vector<8x1xf32>
    %59 = arith.mulf %55, %58 : vector<8x1xf32>
    %60 = arith.mulf %57, %57 : vector<8x1xf32>
    %61 = arith.subf %59, %60 : vector<8x1xf32>
    %62 = vector.broadcast %57 : vector<8x1xf32> to vector<8x32xf32>
    %63 = arith.subf %49, %62 : vector<8x32xf32>
    %cst_23 = arith.constant 9.99999974E-6 : f32
    %64 = vector.broadcast %cst_23 : f32 to vector<8x1xf32>
    %65 = arith.addf %61, %64 : vector<8x1xf32>
    %66 = math.rsqrt %65 : vector<8x1xf32>
    %67 = vector.broadcast %66 : vector<8x1xf32> to vector<8x32xf32>
    %68 = arith.mulf %63, %67 : vector<8x32xf32>
    %69 = vector.broadcast %4 : vector<1x32xf32> to vector<8x32xf32>
    %70 = arith.mulf %68, %69 : vector<8x32xf32>
    %71 = vector.broadcast %5 : vector<1x32xf32> to vector<8x32xf32>
    %72 = arith.addf %70, %71 : vector<8x32xf32>
    %c0_24 = arith.constant 0 : index
    %c0_25 = arith.constant 0 : index
    %73 = vector.load %arg5[%c0_24, %c0_25] : memref<8x64xf32, #tpu.memory_space<vmem>>, vector<8x32xf32>
    tpu.vector_store %arg5[%c0_24, %c0_25], %72 {strides = array<i32>} : memref<8x64xf32, #tpu.memory_space<vmem>>, vector<8x32xf32>,
    %cst_26 = arith.constant dense<0.000000e+00> : vector<8xf32>
    %74 = vector.multi_reduction <add>, %50, %cst_26 [1] : vector<8x32xf32> to vector<8xf32>
    %75 = vector.shape_cast %74 : vector<8xf32> to vector<8x1xf32>
    %76 = arith.mulf %50, %50 : vector<8x32xf32>
    %cst_27 = arith.constant dense<0.000000e+00> : vector<8xf32>
    %77 = vector.multi_reduction <add>, %76, %cst_27 [1] : vector<8x32xf32> to vector<8xf32>
    %78 = vector.shape_cast %77 : vector<8xf32> to vector<8x1xf32>
    %cst_28 = arith.constant 3.125000e-02 : f32
    %79 = vector.broadcast %cst_28 : f32 to vector<8x1xf32>
    %80 = arith.mulf %75, %79 : vector<8x1xf32>
    %cst_29 = arith.constant 3.125000e-02 : f32
    %81 = vector.broadcast %cst_29 : f32 to vector<8x1xf32>
    %82 = arith.mulf %78, %81 : vector<8x1xf32>
    %83 = arith.mulf %80, %80 : vector<8x1xf32>
    %84 = arith.subf %82, %83 : vector<8x1xf32>
    %85 = vector.broadcast %80 : vector<8x1xf32> to vector<8x32xf32>
    %86 = arith.subf %50, %85 : vector<8x32xf32>
    %cst_30 = arith.constant 9.99999974E-6 : f32
    %87 = vector.broadcast %cst_30 : f32 to vector<8x1xf32>
    %88 = arith.addf %84, %87 : vector<8x1xf32>
    %89 = math.rsqrt %88 : vector<8x1xf32>
    %90 = vector.broadcast %89 : vector<8x1xf32> to vector<8x32xf32>
    %91 = arith.mulf %86, %90 : vector<8x32xf32>
    %92 = vector.broadcast %4 : vector<1x32xf32> to vector<8x32xf32>
    %93 = arith.mulf %91, %92 : vector<8x32xf32>
    %94 = vector.broadcast %5 : vector<1x32xf32> to vector<8x32xf32>
    %95 = arith.addf %93, %94 : vector<8x32xf32>
    %c0_31 = arith.constant 0 : index
    %c32 = arith.constant 32 : index
    %96 = vector.load %arg5[%c0_31, %c32] : memref<8x64xf32, #tpu.memory_space<vmem>>, vector<8x32xf32>
    tpu.vector_store %arg5[%c0_31, %c32], %95 {strides = array<i32>} : memref<8x64xf32, #tpu.memory_space<vmem>>, vector<8x32xf32>,
    return
  }
  func.func @transform_0(%arg0: i32) -> (i32, i32) {
    %c0_i32 = arith.constant 0 : i32
    %c0_i32_0 = arith.constant 0 : i32
    return %arg0, %c0_i32 : i32, i32
  }
  func.func @transform_1(%arg0: i32) -> (i32, i32) {
    %c0_i32 = arith.constant 0 : i32
    %c0_i32_0 = arith.constant 0 : i32
    %c0_i32_1 = arith.constant 0 : i32
    return %c0_i32, %c0_i32_0 : i32, i32
  }
  func.func @transform_2(%arg0: i32) -> (i32, i32) {
    %c0_i32 = arith.constant 0 : i32
    %c0_i32_0 = arith.constant 0 : i32
    %c0_i32_1 = arith.constant 0 : i32
    return %c0_i32, %c0_i32_0 : i32, i32
  }
  func.func @transform_3(%arg0: i32) -> (i32, i32) {
    %c0_i32 = arith.constant 0 : i32
    %c0_i32_0 = arith.constant 0 : i32
    %c0_i32_1 = arith.constant 0 : i32
    return %c0_i32, %c0_i32_0 : i32, i32
  }
  func.func @transform_4(%arg0: i32) -> (i32, i32) {
    %c0_i32 = arith.constant 0 : i32
    %c0_i32_0 = arith.constant 0 : i32
    return %arg0, %c0_i32 : i32, i32
  }
}

module attributes {stable_mosaic.version = 11 : i64} {
  func.func @quantum_state_kernel(%arg0: i32, %arg1: memref<8x32xf32, #tpu.memory_space<vmem>>, %arg2: memref<32x64xf32, #tpu.memory_space<vmem>>, %arg3: memref<1x64xf32, #tpu.memory_space<vmem>>, %arg4: memref<6x32xf32, #tpu.memory_space<vmem>>, %arg5: memref<8x64xf32, #tpu.memory_space<vmem>>) attributes {dimension_semantics = [#tpu.dimension_semantics<parallel>], iteration_bounds = array<i64: 2>, scalar_prefetch = 0 : i64, scratch_operands = 0 : i64, tpu.core_type = #tpu.core_type<tc>, window_params = [{transform_indices = @transform_0, window_bounds = array<i64: 8, 32>}, {pipeline_mode = #tpu.pipeline_mode<synchronous>, transform_indices = @transform_1, window_bounds = array<i64: 32, 64>}, {pipeline_mode = #tpu.pipeline_mode<synchronous>, transform_indices = @transform_2, window_bounds = array<i64: 1, 64>}, {pipeline_mode = #tpu.pipeline_mode<synchronous>, transform_indices = @transform_3, window_bounds = array<i64: 6, 32>}, {transform_indices = @transform_4, window_bounds = array<i64: 8, 64>}]} {
    %c0 = arith.constant 0 : index
    %c0_0 = arith.constant 0 : index
    %0 = vector.load %arg4[%c0, %c0_0] : memref<6x32xf32, #tpu.memory_space<vmem>>, vector<1x32xf32>
    %c1 = arith.constant 1 : index
    %c0_1 = arith.constant 0 : index
    %1 = vector.load %arg4[%c1, %c0_1] : memref<6x32xf32, #tpu.memory_space<vmem>>, vector<1x32xf32>
    %c2 = arith.constant 2 : index
    %c0_2 = arith.constant 0 : index
    %2 = vector.load %arg4[%c2, %c0_2] : memref<6x32xf32, #tpu.memory_space<vmem>>, vector<1x32xf32>
    %c3 = arith.constant 3 : index
    %c0_3 = arith.constant 0 : index
    %3 = vector.load %arg4[%c3, %c0_3] : memref<6x32xf32, #tpu.memory_space<vmem>>, vector<1x32xf32>
    %c4 = arith.constant 4 : index
    %c0_4 = arith.constant 0 : index
    %4 = vector.load %arg4[%c4, %c0_4] : memref<6x32xf32, #tpu.memory_space<vmem>>, vector<1x32xf32>
    %c5 = arith.constant 5 : index
    %c0_5 = arith.constant 0 : index
    %5 = vector.load %arg4[%c5, %c0_5] : memref<6x32xf32, #tpu.memory_space<vmem>>, vector<1x32xf32>
    %c0_6 = arith.constant 0 : index
    %c0_7 = arith.constant 0 : index
    %6 = vector.load %arg1[%c0_6, %c0_7] : memref<8x32xf32, #tpu.memory_space<vmem>>, vector<8x32xf32>
    %cst = arith.constant dense<0.000000e+00> : vector<8xf32>
    %7 = vector.multi_reduction <add>, %6, %cst [1] : vector<8x32xf32> to vector<8xf32>
    %8 = vector.shape_cast %7 : vector<8xf32> to vector<8x1xf32>
    %9 = arith.mulf %6, %6 : vector<8x32xf32>
    %cst_8 = arith.constant dense<0.000000e+00> : vector<8xf32>
    %10 = vector.multi_reduction <add>, %9, %cst_8 [1] : vector<8x32xf32> to vector<8xf32>
    %11 = vector.shape_cast %10 : vector<8xf32> to vector<8x1xf32>
    %cst_9 = arith.constant 3.125000e-02 : f32
    %12 = vector.broadcast %cst_9 : f32 to vector<8x1xf32>
    %13 = arith.mulf %8, %12 : vector<8x1xf32>
    %cst_10 = arith.constant 3.125000e-02 : f32
    %14 = vector.broadcast %cst_10 : f32 to vector<8x1xf32>
    %15 = arith.mulf %11, %14 : vector<8x1xf32>
    %16 = arith.mulf %13, %13 : vector<8x1xf32>
    %17 = arith.subf %15, %16 : vector<8x1xf32>
    %18 = vector.broadcast %13 : vector<8x1xf32> to vector<8x32xf32>
    %19 = arith.subf %6, %18 : vector<8x32xf32>
    %cst_11 = arith.constant 9.99999974E-6 : f32
    %20 = vector.broadcast %cst_11 : f32 to vector<8x1xf32>
    %21 = arith.addf %17, %20 : vector<8x1xf32>
    %22 = math.rsqrt %21 : vector<8x1xf32>
    %23 = vector.broadcast %22 : vector<8x1xf32> to vector<8x32xf32>
    %24 = arith.mulf %19, %23 : vector<8x32xf32>
    %25 = vector.broadcast %2 : vector<1x32xf32> to vector<8x32xf32>
    %26 = arith.mulf %24, %25 : vector<8x32xf32>
    %27 = vector.broadcast %3 : vector<1x32xf32> to vector<8x32xf32>
    %28 = arith.addf %26, %27 : vector<8x32xf32>
    %cst_12 = arith.constant 0.00999999977 : f32
    %29 = vector.broadcast %cst_12 : f32 to vector<8x32xf32>
    %30 = arith.mulf %28, %29 : vector<8x32xf32>
    %c0_13 = arith.constant 0 : index
    %c0_14 = arith.constant 0 : index
    %31 = vector.load %arg2[%c0_13, %c0_14] : memref<32x64xf32, #tpu.memory_space<vmem>>, vector<32x64xf32>
    %cst_15 = arith.constant dense<0.000000e+00> : vector<8x64xf32>
    %32 = tpu.matmul %30, %31, %cst_15 {dimension_numbers = #tpu.dot_dimension_numbers<[1], [0], [0], [1], [0, 0, 1, 1], [], []>} : vector<8x32xf32>, vector<32x64xf32>, vector<8x64xf32> -> vector<8x64xf32>
    %c0_16 = arith.constant 0 : index
    %c0_17 = arith.constant 0 : index
    %33 = vector.load %arg3[%c0_16, %c0_17] : memref<1x64xf32, #tpu.memory_space<vmem>>, vector<1x64xf32>
    %34 = vector.broadcast %33 : vector<1x64xf32> to vector<8x64xf32>
    %35 = arith.addf %32, %34 : vector<8x64xf32>
    %36 = vector.extract_strided_slice %35 {offsets = [0, 0], sizes = [8, 32], strides = [1, 1]} : vector<8x64xf32> to vector<8x32xf32>
    %37 = vector.extract_strided_slice %35 {offsets = [0, 32], sizes = [8, 32], strides = [1, 1]} : vector<8x64xf32> to vector<8x32xf32>
    %38 = vector.broadcast %0 : vector<1x32xf32> to vector<8x32xf32>
    %39 = arith.mulf %37, %38 : vector<8x32xf32>
    %40 = arith.addf %36, %39 : vector<8x32xf32>
    %41 = vector.broadcast %1 : vector<1x32xf32> to vector<8x32xf32>
    %42 = arith.mulf %37, %41 : vector<8x32xf32>
    %43 = arith.mulf %40, %40 : vector<8x32xf32>
    %44 = arith.mulf %42, %42 : vector<8x32xf32>
    %45 = arith.addf %43, %44 : vector<8x32xf32>
    %cst_18 = arith.constant 9.99999993E-9 : f32
    %46 = vector.broadcast %cst_18 : f32 to vector<8x32xf32>
    %47 = arith.addf %45, %46 : vector<8x32xf32>
    %48 = math.rsqrt %47 : vector<8x32xf32>
    %49 = arith.mulf %40, %48 : vector<8x32xf32>
    %50 = arith.mulf %42, %48 : vector<8x32xf32>
    %cst_19 = arith.constant dense<0.000000e+00> : vector<8xf32>
    %51 = vector.multi_reduction <add>, %49, %cst_19 [1] : vector<8x32xf32> to vector<8xf32>
    %52 = vector.shape_cast %51 : vector<8xf32> to vector<8x1xf32>
    %53 = arith.mulf %49, %49 : vector<8x32xf32>
    %cst_20 = arith.constant dense<0.000000e+00> : vector<8xf32>
    %54 = vector.multi_reduction <add>, %53, %cst_20 [1] : vector<8x32xf32> to vector<8xf32>
    %55 = vector.shape_cast %54 : vector<8xf32> to vector<8x1xf32>
    %cst_21 = arith.constant 3.125000e-02 : f32
    %56 = vector.broadcast %cst_21 : f32 to vector<8x1xf32>
    %57 = arith.mulf %52, %56 : vector<8x1xf32>
    %cst_22 = arith.constant 3.125000e-02 : f32
    %58 = vector.broadcast %cst_22 : f32 to vector<8x1xf32>
    %59 = arith.mulf %55, %58 : vector<8x1xf32>
    %60 = arith.mulf %57, %57 : vector<8x1xf32>
    %61 = arith.subf %59, %60 : vector<8x1xf32>
    %62 = vector.broadcast %57 : vector<8x1xf32> to vector<8x32xf32>
    %63 = arith.subf %49, %62 : vector<8x32xf32>
    %cst_23 = arith.constant 9.99999974E-6 : f32
    %64 = vector.broadcast %cst_23 : f32 to vector<8x1xf32>
    %65 = arith.addf %61, %64 : vector<8x1xf32>
    %66 = math.rsqrt %65 : vector<8x1xf32>
    %67 = vector.broadcast %66 : vector<8x1xf32> to vector<8x32xf32>
    %68 = arith.mulf %63, %67 : vector<8x32xf32>
    %69 = vector.broadcast %4 : vector<1x32xf32> to vector<8x32xf32>
    %70 = arith.mulf %68, %69 : vector<8x32xf32>
    %71 = vector.broadcast %5 : vector<1x32xf32> to vector<8x32xf32>
    %72 = arith.addf %70, %71 : vector<8x32xf32>
    %c0_24 = arith.constant 0 : index
    %c0_25 = arith.constant 0 : index
    %73 = vector.load %arg5[%c0_24, %c0_25] : memref<8x64xf32, #tpu.memory_space<vmem>>, vector<8x32xf32>
    tpu.vector_store %arg5[%c0_24, %c0_25], %72 {strides = array<i32>} : memref<8x64xf32, #tpu.memory_space<vmem>>, vector<8x32xf32>,
    %cst_26 = arith.constant dense<0.000000e+00> : vector<8xf32>
    %74 = vector.multi_reduction <add>, %50, %cst_26 [1] : vector<8x32xf32> to vector<8xf32>
    %75 = vector.shape_cast %74 : vector<8xf32> to vector<8x1xf32>
    %76 = arith.mulf %50, %50 : vector<8x32xf32>
    %cst_27 = arith.constant dense<0.000000e+00> : vector<8xf32>
    %77 = vector.multi_reduction <add>, %76, %cst_27 [1] : vector<8x32xf32> to vector<8xf32>
    %78 = vector.shape_cast %77 : vector<8xf32> to vector<8x1xf32>
    %cst_28 = arith.constant 3.125000e-02 : f32
    %79 = vector.broadcast %cst_28 : f32 to vector<8x1xf32>
    %80 = arith.mulf %75, %79 : vector<8x1xf32>
    %cst_29 = arith.constant 3.125000e-02 : f32
    %81 = vector.broadcast %cst_29 : f32 to vector<8x1xf32>
    %82 = arith.mulf %78, %81 : vector<8x1xf32>
    %83 = arith.mulf %80, %80 : vector<8x1xf32>
    %84 = arith.subf %82, %83 : vector<8x1xf32>
    %85 = vector.broadcast %80 : vector<8x1xf32> to vector<8x32xf32>
    %86 = arith.subf %50, %85 : vector<8x32xf32>
    %cst_30 = arith.constant 9.99999974E-6 : f32
    %87 = vector.broadcast %cst_30 : f32 to vector<8x1xf32>
    %88 = arith.addf %84, %87 : vector<8x1xf32>
    %89 = math.rsqrt %88 : vector<8x1xf32>
    %90 = vector.broadcast %89 : vector<8x1xf32> to vector<8x32xf32>
    %91 = arith.mulf %86, %90 : vector<8x32xf32>
    %92 = vector.broadcast %4 : vector<1x32xf32> to vector<8x32xf32>
    %93 = arith.mulf %91, %92 : vector<8x32xf32>
    %94 = vector.broadcast %5 : vector<1x32xf32> to vector<8x32xf32>
    %95 = arith.addf %93, %94 : vector<8x32xf32>
    %c0_31 = arith.constant 0 : index
    %c32 = arith.constant 32 : index
    %96 = vector.load %arg5[%c0_31, %c32] : memref<8x64xf32, #tpu.memory_space<vmem>>, vector<8x32xf32>
    tpu.vector_store %arg5[%c0_31, %c32], %95 {strides = array<i32>} : memref<8x64xf32, #tpu.memory_space<vmem>>, vector<8x32xf32>,
    return
  }
  func.func @transform_0(%arg0: i32) -> (i32, i32) {
    %c0_i32 = arith.constant 0 : i32
    %c0_i32_0 = arith.constant 0 : i32
    return %arg0, %c0_i32 : i32, i32
  }
  func.func @transform_1(%arg0: i32) -> (i32, i32) {
    %c0_i32 = arith.constant 0 : i32
    %c0_i32_0 = arith.constant 0 : i32
    %c0_i32_1 = arith.constant 0 : i32
    return %c0_i32, %c0_i32_0 : i32, i32
  }
  func.func @transform_2(%arg0: i32) -> (i32, i32) {
    %c0_i32 = arith.constant 0 : i32
    %c0_i32_0 = arith.constant 0 : i32
    %c0_i32_1 = arith.constant 0 : i32
    return %c0_i32, %c0_i32_0 : i32, i32
  }
  func.func @transform_3(%arg0: i32) -> (i32, i32) {
    %c0_i32 = arith.constant 0 : i32
    %c0_i32_0 = arith.constant 0 : i32
    %c0_i32_1 = arith.constant 0 : i32
    return %c0_i32, %c0_i32_0 : i32, i32
  }
  func.func @transform_4(%arg0: i32) -> (i32, i32) {
    %c0_i32 = arith.constant 0 : i32
    %c0_i32_0 = arith.constant 0 : i32
    return %arg0, %c0_i32 : i32, i32
  }
}

</mosaic_0001>

<bundles_post_ra>
// kernel: tpu_custom_call.1
= control target key start
LH: loop header
LB: loop body
LE: loop exit
PB: predicated region body
PF: predicated region fallthrough
CT: control target
= control target key end

     0   :  { %9 = vsyncpa [#allocation3], 0  ;;  %s1054_s0 = inlined_call_operand.hbm [shape: f32[16,32], index: 0, kind: input, shape index: {}]   ;;  %s1055_s1 = inlined_call_operand.hbm [shape: f32[32,64], index: 1, kind: input, shape index: {}]   ;;  %s1056_s2 = inlined_call_operand.vmem [shape: f32[1,64], index: 2, kind: input, shape index: {}]   ;;  %s1057_s3 = inlined_call_operand.vmem [shape: f32[6,32], index: 3, kind: input, shape index: {}]   ;;  %s1058_s4 = inlined_call_operand.hbm [shape: f32[16,64], index: 4, kind: output, shape index: {}]  }
   0x1   :  { %11 = vsyncpa [#allocation3 + $0x1], 0 }
   0x2   :  { %12 = vsyncpa [#allocation6], 0 }
   0x3   :  { %13 = vsyncpa [#allocation4], 0 }
   0x4   :  { %15 = vsyncpa [#allocation4 + $0x1], 0  ;;  %s820_s15 = smov 0   ;;  %s822_s16 = smov 0  }
   0x5   :  { %s824_s17 = smov 0   ;;  %s826_s18 = smov 0  }
   0x6 LB: > { %s841_s19 = sadd.s32 4294967295, %s783_s18   ;;  %s539_s20 = sadd.s32 4294967294, %s783_s18   ;;  %s783_s18 = sphi %s826_s18, %s1078_s18   ;;  %s779_s17 = sphi %s824_s17, %s1077_s17   ;;  %s775_s16 = sphi %s822_s16, %s1076_s16   ;;  %s771_s15 = sphi %s820_s15, %s1075_s15  }
   0x7   : > { %p41_p0 = scmp.ne.s32.totalorder %s775_s16, %s771_s15  ;;  %p1059_p1 = scmp.eq.s32.totalorder %s841_s19, 0 }
   0x8   : > { %p134_p3 = scmp.eq.s32.totalorder %s539_s20, 1  ;;  %p540_p5 = scmp.ge.s32.totalorder %s783_s18, 1 }
   0x9   : > { %p850_p4 = por %p1059_p1, %p41_p0  ;;  %p141_p7 = scmp.lt.s32.totalorder %s783_s18, 3 }
   0xa   : > { %p855_p6 = por %p134_p3, %p41_p0  ;;  %s785_s24 = smov [#allocation5]  }
   0xb   : > { %s1062_s21 = scalar_select %p850_p4, 1, 0 }
   0xc   : > { %s1063_s22 = scalar_select %p855_p6, 1, 0 }
   0xd   : > { %p860_p8 = pnand %p540_p5, %p141_p7  ;;  %s153_s25 = sshll.u32 %s785_s24, 4  ;;  %s864_s25 = int_to_ptr.vmem [resolvable:$true] %s153_s25 }
   0xe   : > { %s876_s27 = sadd.s32 1, %s783_s18   ;;  %s28_s28 = sadd.s32 1, %s779_s17 }
   0xf   : > { %s1064_s23 = scalar_select %p860_p8, 1, 0 }
  0x10   : > { %p591_p9 = pneg %p860_p8  ;;  %s25_s29 = ssub.s32 %s783_s18, %s876_s27 }
  0x11   : > { %s655_s6 = scalar_lea.hbm %s1055_s1, 512 }
  0x12   : > { %p871_p11 = pnand %p591_p9, %p1059_p1  ;;  %p656_p12 = scmp.ne.s32.totalorder %s1055_s1, %s655_s6 }
  0x13   : > { %p662_p5 = scmp.lt.u32.totalorder %s655_s6, %s1055_s1 }
  0x14   : > { %p657_p13 = pneg %p871_p11 }
  0x16   : > { %p658_p0 = pnand %p657_p13, %p656_p12 }
  0x18   : > { %p659_p3 = pneg %p658_p0 }
  0x1a   : > { %p664_p7 = pnand %p662_p5, %p659_p3 }
  0x1c   : > { %667 = shalt.err (!%p664_p7)
}
  0x1d   : > { %s668_s11 = scalar_lea.vmem %s864_s25, 512  ;;  %p676_p2 = scmp.lt.s32.totalorder %s864_s25, %s864_s25 }
  0x1e   : > { %p669_p9 = scmp.ne.s32.totalorder %s864_s25, %s668_s11  ;;  %p677_p6 = scmp.lt.s32.totalorder %s668_s11, %s668_s11 }
  0x20   : > { %p671_p10 = pnand %p669_p9, %p657_p13  ;;  %p678_p4 = por %p677_p6, %p676_p2 }
  0x22   : > { %p672_p1 = pneg %p671_p10 }
  0x24   : > { %p679_p8 = pnand %p678_p4, %p672_p1 }
  0x26   : > { %682 = shalt.err (!%p679_p8)
}
  0x27   : > { %s786_s12 = smov 128   ;;  %s787_s13 = smov 8  }
  0x28   : > { %594 = dma.hbm_to_vmem [thread:$0]  (!%p871_p11), %s1055_s1, 512, %s864_s25, [#allocation6], %s786_s12, %s786_s12, %s787_s13  }
  0x29   : > { %p26_p2 = scmp.eq.s32.totalorder %s25_s29, 0  ;;  %p35_p1 = scmp.ne.s32.totalorder %s779_s17, %s775_s16 }
  0x2a   : > { %p36_p4 = scmp.eq.s32.totalorder %s783_s18, 0  ;;  %p604_p6 = scmp.lt.s32.totalorder %s783_s18, 2 }
  0x2b   : > { %s907_s24 = scalar_select %p26_p2, %s779_s17, %s28_s28  }
  0x2c   : > { %p37_p8 = por %p36_p4, %p35_p1  ;;  %p1066_p10 = scmp.eq.s32.totalorder %s841_s19, 1 }
  0x2d   : > { %s173_s5 = sand.u32 1, %s779_s17   ;;  %s544_s6 = sshll.u32 %s783_s18, 7 }
  0x2e   : > { %p911_p12 = por %p1066_p10, %p35_p1  ;;  %s543_s7 = sshll.u32 %s173_s5, 3 }
  0x2f   : > { %s920_s9 = scalar_lea.hbm %s1054_s0, %s544_s6  ;;  %s177_s25 = scalar_lea.vmem [#allocation2], %s543_s7 }
  0x30   : > { %s184_s28 = sshll.u32 %s177_s25, 4  ;;  %p922_p11 = pnand %p604_p6, %p37_p8  ;;  %s926_s28 = int_to_ptr.vmem [resolvable:$true] %s184_s28 }
  0x31   : > { %s174_s10 = scalar_lea.sflag [#allocation3], %s173_s5  ;;  %s683_s11 = scalar_lea.hbm %s920_s9, 128 }
  0x32   : > { %p684_p13 = scmp.ne.s32.totalorder %s920_s9, %s683_s11  ;;  %p685_p0 = pneg %p922_p11 }
  0x33   : > { %s688_s14 = scalar_lea.hbm %s1054_s0, 256  ;;  %p689_p7 = scmp.lt.u32.totalorder %s920_s9, %s1054_s0 }
  0x34   : > { %p686_p3 = pnand %p685_p0, %p684_p13  ;;  %p690_p9 = scmp.lt.u32.totalorder %s688_s14, %s683_s11 }
  0x35   : > { %p692_p1 = scmp.lt.u32.totalorder %s683_s11, %s920_s9 }
  0x36   : > { %p687_p5 = pneg %p686_p3  ;;  %p691_p2 = por %p690_p9, %p689_p7 }
  0x38   : > { %p693_p4 = por %p692_p1, %p691_p2 }
  0x3a   : > { %p694_p6 = pnand %p693_p4, %p687_p5 }
  0x3c   : > { %697 = shalt.err (!%p694_p6)
}
  0x3d   : > { %s698_s5 = scalar_lea.vmem %s926_s28, 128  ;;  %s788_s7 = smov [#allocation2]  }
  0x3e   : > { %p699_p8 = scmp.ne.s32.totalorder %s926_s28, %s698_s5  ;;  %s703_s26 = sshll.u32 %s788_s7, 4  ;;  %s704_s26 = int_to_ptr.vmem [resolvable:$false] %s703_s26 }
  0x3f   : > { %s705_s8 = scalar_lea.vmem %s704_s26, 256  ;;  %p706_p3 = scmp.lt.s32.totalorder %s926_s28, %s704_s26 }
  0x40   : > { %p701_p10 = pnand %p699_p8, %p685_p0  ;;  %p707_p7 = scmp.lt.s32.totalorder %s705_s8, %s698_s5 }
  0x42   : > { %p702_p13 = pneg %p701_p10  ;;  %p708_p9 = por %p707_p7, %p706_p3 }
  0x44   : > { %p709_p2 = pnand %p708_p9, %p702_p13 }
  0x46   : > { %712 = shalt.err (!%p709_p2)
}
  0x47   : > { %598 = dma.hbm_to_vmem [thread:$0]  (!%p922_p11), %s920_s9, 128, %s926_s28, %s174_s10  }
  0x48   : > { %p1069_p5 = scmp.ne.s32.totalorder %s1064_s23, 0 }
  0x49   : > { %s956_s25 = sand.u32 (!%p1069_p5), 1, %s775_s16   ;;  %p1070_p0 = scmp.ne.s32.totalorder (!%p1069_p5), %s1062_s21, 0 }
  0x4a   : > { %193 = sbr.rel (%p1069_p5) target bundleno = 1024 (0x400), region = 36  ;;  %s546_s11 = sshll.u32 (!%p1069_p5), %s956_s25, 3 }
  0x4b   : > { %s196_s12 = scalar_lea.sflag (!%p1069_p5), [#allocation3], %s956_s25  ;;  %s199_s13 = scalar_lea.vmem (!%p1069_p5), [#allocation2], %s546_s11 }
  0x51   : > { %758 = dma.done.wait (%p1070_p0), %s196_s12, 128  }
  0x52   : > { %760 = vsyncadd (%p1070_p0), %s196_s12, 4294967168  ;;  %p1071_p11 = scmp.eq.s32.totalorder %s841_s19, 0 }
  0x54   : > { %762 = dma.done.wait (%p1071_p11), [#allocation6], 512   ;;  %p1072_p1 = pmov %p1071_p11 }
  0x55   : > { %vm235_vm0 = vcmask 261120   ;;  %v234_v0 = vld [vmem:[%s199_s13] sm:$0xff]  ;;  %v262_v4 = vld [vmem:[#allocation5] sm:$0xff]  ;;  %v263_v5 = vld [vmem:[#allocation5 + $0x8] sm:$0xff]  ;;  %v789_v7 = vmov 0.0|0.0   ;;  %vm790_vm1 = vmmov 0  }
  0x56   : > { %764 = vsyncadd (%p1072_p1), [#allocation6], 4294966784  ;;  %v236_v1 = vsel %vm235_vm0, %v234_v0, 0.0  ;;  %v239_v2 = vmul.f32 %v234_v0, %v234_v0  ;;  %v264_v6 = vld [vmem:[#allocation5 + $0x10] sm:$0xff]  ;;  %577 = vmatprep.subr.bf16.mxu0 %v789_v7  ;;  %v578_v8 = vpack.c.bf16 %v263_v5, %v262_v4  ;;  %v265_v9 = vld [vmem:[#allocation5 + $0x18] sm:$0xff]  ;;  %v791_v10 = vmov 0.0  }
  0x57   : > { %237 = vadd.xlane.f32.xlu0 %v236_v1  ;;  %574 = vmatprep.mubr.msk.f32.mxu0 %vm790_vm1, %v791_v10  ;;  %v581_v11 = vpack.c.bf16 %v265_v9, %v264_v6  ;;  %v553_v12 = vld [vmem:[%s1057_s3] ss:$0 sm:$0xff]  ;;  %s792_s9 = smov 32   ;;  %v554_v13 = vld [vmem:[%s1057_s3 + $0x1] ss:$0 sm:$0xff]  ;;  %s793_s26 = smov 96  }
  0x58   : > { %v240_v3 = vsel %vm235_vm0, %v239_v2, 0.0  ;;  %579 = vmatpush3.bf16.msra.mxu0 %v578_v8  ;;  %351 = vrot.lane.b32.xlu1 %v553_v12, %s792_s9  ;;  %v549_v23 = vld [vmem:[%s1057_s3 + $0x2] ss:$0 sm:$0xff]  ;;  %v550_v25 = vld [vmem:[%s1057_s3 + $0x3] ss:$0 sm:$0xff]  ;;  %s227_s23 = scalar_lea.vmem [#allocation7], %s546_s11 }
  0x59   : > { %580 = vmatprep.subr.bf16.mxu0 %v789_v7  ;;  %v551_v30 = vld [vmem:[%s1056_s2] ss:$0 sm:$0xff]  ;;  %v555_v52 = vld [vmem:[%s1057_s3 + $0x4] ss:$0 sm:$0xff]  ;;  %v556_v57 = vld [vmem:[%s1057_s3 + $0x5] ss:$0 sm:$0xff] }
  0x5a   : > { %s459_s28 = sshll.u32 %s227_s23, 4  ;;  %vm443_vm2 = vcmask 523520   ;;  %s446_s14 = scalar_lea.sflag [#allocation4], %s956_s25  ;;  %s1012_s28 = int_to_ptr.vmem [resolvable:$true] %s459_s28 }
  0x5b   : > { %241 = vadd.xlane.f32.xlu0 %v240_v3  ;;  %s713_s20 = scalar_lea.vmem %s1012_s28, 128 }
  0x5c   : > { %582 = vmatpush3.bf16.msra.mxu0 %v581_v11  ;;  %365 = vrot.lane.b32.xlu1 %v554_v13, %s792_s9  ;;  %p714_p4 = scmp.ne.s32.totalorder %s1012_s28, %s713_s20 }
  0x5e   : > { %p715_p6 = pnand %p714_p4, %p911_p12 }
  0x60   : > { %p716_p8 = pneg %p715_p6 }
  0xca   : > { %v352_v29 = vpop.permute.xlu1 %351 }
  0xce   : > { %v366_v32 = vpop.permute.xlu1 %365 }
  0xe4   : > { %v238_v14 = vpop.xlane.xlu0 %237 }
  0xe5   : > { %v243_v15 = vmul.f32 0.03125, %v238_v14 }
  0xe7   : > { %v245_v17 = vmul.f32 %v243_v15, %v243_v15  ;;  %v247_v21 = vsub.f32 %v234_v0, %v243_v15 }
  0xe8   : > { %v242_v16 = vpop.xlane.xlu0 %241 }
  0xe9   : > { %v244_v18 = vmul.f32 0.03125, %v242_v16 }
  0xeb   : > { %v246_v19 = vsub.f32 %v244_v18, %v245_v17 }
  0xed   : > { %v248_v20 = vadd.f32 1e-05, %v246_v19 }
  0xef   : > { %647 = vrsqrt.f32 %v248_v20 }
  0xf9   : > { %v648_v22 = vpop.eup %647 }
  0xfa   : > { %v250_v24 = vmul.f32 %v648_v22, %v247_v21 }
  0xfc   : > { %v255_v26 = vmul.f32 %v549_v23, %v250_v24 }
  0xfe   : > { %v260_v27 = vadd.f32 %v550_v25, %v255_v26 }
 0x100   : > { %v261_v28 = vmul.f32 0.01, %v260_v27 }
 0x102   : > { %575 = vmatmul.mubr.msk.f32.vlgmr.msra.gmra.mrb[0].mxu0 %vm235_vm0, %v261_v28 }
 0x1d5   : > { %v342_v31 = vpop.f32.mrb[0].mxu0 }
 0x1d6   : > { %v343_v33 = vadd.f32 %v551_v30, %v342_v31  ;;  %v576_v34 = vpop.f32.mrb[1].mxu0 }
 0x1d8   : > { %v368_v35 = vmul.f32 %v366_v32, %v343_v33  ;;  %v354_v36 = vmul.f32 %v352_v29, %v343_v33 }
 0x1da   : > { %v370_v37 = vmul.f32 %v368_v35, %v368_v35  ;;  %356 = vrot.lane.b32.xlu0 %v354_v36, %s793_s26 }
 0x1dc   : > { %372 = vrot.lane.b32.xlu1 %v370_v37, %s793_s26 }
 0x24c   : > { %v357_v38 = vpop.permute.xlu0 %356 }
 0x24d   : > { %v359_v39 = vadd.f32 %v357_v38, %v343_v33 }
 0x24e   : > { %v373_v41 = vpop.permute.xlu1 %372 }
 0x24f   : > { %v369_v40 = vmul.f32 %v359_v39, %v359_v39 }
 0x251   : > { %v375_v42 = vadd.f32 %v373_v41, %v369_v40 }
 0x253   : > { %v376_v43 = vadd.f32 1e-08, %v375_v42 }
 0x255   : > { %649 = vrsqrt.f32 %v376_v43 }
 0x25f   : > { %v650_v44 = vpop.eup %649 }
 0x260   : > { %380 = vrot.lane.b32.xlu1 %v650_v44, %s792_s9  ;;  %v378_v45 = vmul.f32 %v650_v44, %v359_v39 }
 0x262   : > { %v384_v49 = vsel %vm235_vm0, %v378_v45, 0.0  ;;  %v387_v50 = vmul.f32 %v378_v45, %v378_v45 }
 0x264   : > { %v388_v51 = vsel %vm235_vm0, %v387_v50, 0.0 }
 0x2d2   : > { %v381_v46 = vpop.permute.xlu1 %380 }
 0x2d3   : > { %v383_v47 = vmul.f32 %v381_v46, %v368_v35 }
 0x2d5   : > { %411 = vrot.lane.b32.xlu1 %v383_v47, %s793_s26  ;;  %v417_v48 = vmul.f32 %v383_v47, %v383_v47 }
 0x2d9   : > { %419 = vrot.lane.b32.xlu1 %v417_v48, %s793_s26 }
 0x2fd   : > { %385 = vadd.xlane.f32.xlu1 %v384_v49 }
 0x301   : > { %389 = vadd.xlane.f32.xlu1 %v388_v51 }
 0x312   : > { %434 = vrot.lane.b32.xlu1 %v555_v52, %s792_s9 }
 0x347   : > { %v412_v53 = vpop.permute.xlu1 %411 }
 0x348   : > { %v414_v54 = vsel %vm235_vm0, %v412_v53, 0.0 }
 0x349   : > { %415 = vadd.xlane.f32.xlu0 %v414_v54 }
 0x34b   : > { %v420_v55 = vpop.permute.xlu1 %419 }
 0x34c   : > { %v422_v56 = vsel %vm235_vm0, %v420_v55, 0.0 }
 0x34d   : > { %423 = vadd.xlane.f32.xlu0 %v422_v56 }
 0x363   : > { %439 = vrot.lane.b32.xlu0 %v556_v57, %s792_s9  ;;  %s558_s9 = sshll.u32 %s841_s19, 7  ;;  %s794_s19 = smov [#allocation7]  }
 0x364   : > { %s1010_s10 = scalar_lea.hbm %s1058_s4, %s558_s9  ;;  %s717_s6 = sshll.u32 %s794_s19, 4  ;;  %s718_s6 = int_to_ptr.vmem [resolvable:$false] %s717_s6 }
 0x365   : > { %s719_s5 = scalar_lea.vmem %s718_s6, 256  ;;  %p720_p10 = scmp.lt.s32.totalorder %s1012_s28, %s718_s6 }
 0x366   : > { %p721_p13 = scmp.lt.s32.totalorder %s719_s5, %s713_s20 }
 0x368   : > { %p722_p3 = por %p721_p13, %p720_p10 }
 0x36a   : > { %p723_p7 = pnand %p722_p3, %p716_p8 }
 0x38a   : > { %v386_v58 = vpop.xlane.xlu1 %385 }
 0x38b   : > { %v391_v59 = vmul.f32 0.03125, %v386_v58 }
 0x38d   : > { %v393_v61 = vmul.f32 %v391_v59, %v391_v59  ;;  %v395_v1 = vsub.f32 %v378_v45, %v391_v59 }
 0x38e   : > { %v390_v60 = vpop.xlane.xlu1 %389 }
 0x38f   : > { %v392_v62 = vmul.f32 0.03125, %v390_v60 }
 0x391   : > { %v394_v63 = vsub.f32 %v392_v62, %v393_v61 }
 0x392   : > { %v435_v15 = vpop.permute.xlu1 %434 }
 0x393   : > { %v396_v0 = vadd.f32 1e-05, %v394_v63 }
 0x395   : > { %651 = vrsqrt.f32 %v396_v0 }
 0x39f   : > { %v652_v2 = vpop.eup %651 }
 0x3a0   : > { %v398_v3 = vmul.f32 %v652_v2, %v395_v1 }
 0x3a2   : > { %v403_v4 = vmul.f32 %v555_v52, %v398_v3 }
 0x3a4   : > { %v408_v5 = vadd.f32 %v556_v57, %v403_v4 }
 0x3a6   : > { %409 = vst.msk [vmem:[%s227_s23] sm:$0xff] %vm235_vm0, %v408_v5 }
 0x3d6   : > { %v416_v6 = vpop.xlane.xlu0 %415 }
 0x3d7   : > { %v425_v7 = vmul.f32 0.03125, %v416_v6 }
 0x3d9   : > { %v427_v9 = vmul.f32 %v425_v7, %v425_v7  ;;  %v429_v13 = vsub.f32 %v383_v47, %v425_v7 }
 0x3da   : > { %v424_v8 = vpop.xlane.xlu0 %423 }
 0x3db   : > { %v426_v10 = vmul.f32 0.03125, %v424_v8 }
 0x3dd   : > { %v428_v11 = vsub.f32 %v426_v10, %v427_v9 }
 0x3de   : > { %v440_v17 = vpop.permute.xlu0 %439 }
 0x3df   : > { %v430_v12 = vadd.f32 1e-05, %v428_v11 }
 0x3e1   : > { %653 = vrsqrt.f32 %v430_v12 }
 0x3eb   : > { %v654_v14 = vpop.eup %653 }
 0x3ec   : > { %v432_v16 = vmul.f32 %v654_v14, %v429_v13 }
 0x3ee   : > { %v437_v18 = vmul.f32 %v435_v15, %v432_v16 }
 0x3f0   : > { %v442_v19 = vadd.f32 %v440_v17, %v437_v18 }
 0x3f2   : > { %444 = vst.msk [vmem:[%s227_s23] sm:$0xff] %vm443_vm2, %v442_v19 }
 0x3f3   : > { %726 = shalt.err (!%p723_p7)
}
 0x3f4   : > { %s727_s25 = scalar_lea.hbm %s1010_s10, 128  ;;  %s731_s8 = scalar_lea.hbm %s1058_s4, 256 }
 0x3f5   : > { %p728_p9 = scmp.ne.s32.totalorder %s1010_s10, %s727_s25  ;;  %p732_p0 = scmp.lt.u32.totalorder %s1010_s10, %s1058_s4 }
 0x3f6   : > { %p733_p11 = scmp.lt.u32.totalorder %s731_s8, %s727_s25  ;;  %p735_p4 = scmp.lt.u32.totalorder %s727_s25, %s1010_s10 }
 0x3f7   : > { %p729_p2 = pnand %p728_p9, %p911_p12 }
 0x3f8   : > { %p734_p1 = por %p733_p11, %p732_p0 }
 0x3f9   : > { %p730_p5 = pneg %p729_p2 }
 0x3fa   : > { %p736_p6 = por %p735_p4, %p734_p1 }
 0x3fc   : > { %p737_p8 = pnand %p736_p6, %p730_p5 }
 0x3fe   : > { %740 = shalt.err (!%p737_p8)
}
 0x3ff   : > { %589 = dma.vmem_to_hbm [thread:$0]  (%p911_p12), %s1012_s28, 128, %s1010_s10, %s446_s14  }
 0x400 PF: > { %s471_s21 = sand.u32 1, %s771_s15   ;;  %p1073_p10 = scmp.ne.s32.totalorder %s1063_s22, 0 }
 0x401   : > { %p1074_p13 = scmp.ge.s32.totalorder %s783_s18, 2  ;;  %s472_s23 = scalar_lea.sflag [#allocation4], %s471_s21 }
 0x403   : > { %p600_p3 = pnand %p1074_p13, %p1073_p10 }
 0x405   : > { %766 = dma.done.wait (!%p600_p3), %s472_s23, 128  }
 0x406   : > { %768 = vsyncadd (!%p600_p3), %s472_s23, 4294967168  ;;  %p18_p7 = scmp.ge.s32.totalorder %s876_s27, 4   ;;  %s1075_s15 = smov %s775_s16 }
 0x407   : > { %s1076_s16 = smov %s779_s17  ;;  %s1077_s17 = smov %s907_s24 }
 0x408   : > { %s1078_s18 = smov %s876_s27  ;;  %20 = sbr.rel (!%p18_p7) target bundleno = 6 (0x6), region = 85 }
 0x40f   :  { %477 = vsyncpa [#allocation3], 1 }
 0x410   :  { %479 = vsyncpa [#allocation3 + $0x1], 1 }
 0x411   :  { %480 = vsyncpa [#allocation6], 1 }
 0x412   :  { %481 = vsyncpa [#allocation4], 1 }
 0x413   :  { %483 = vsyncpa [#allocation4 + $0x1], 1 }

// kernel: tpu_custom_call.1
= control target key start
LH: loop header
LB: loop body
LE: loop exit
PB: predicated region body
PF: predicated region fallthrough
CT: control target
= control target key end

     0   :  { %9 = vsyncpa [#allocation3], 0  ;;  %s1054_s0 = inlined_call_operand.hbm [shape: f32[16,32], index: 0, kind: input, shape index: {}]   ;;  %s1055_s1 = inlined_call_operand.hbm [shape: f32[32,64], index: 1, kind: input, shape index: {}]   ;;  %s1056_s2 = inlined_call_operand.vmem [shape: f32[1,64], index: 2, kind: input, shape index: {}]   ;;  %s1057_s3 = inlined_call_operand.vmem [shape: f32[6,32], index: 3, kind: input, shape index: {}]   ;;  %s1058_s4 = inlined_call_operand.hbm [shape: f32[16,64], index: 4, kind: output, shape index: {}]  }
   0x1   :  { %11 = vsyncpa [#allocation3 + $0x1], 0 }
   0x2   :  { %12 = vsyncpa [#allocation6], 0 }
   0x3   :  { %13 = vsyncpa [#allocation4], 0 }
   0x4   :  { %15 = vsyncpa [#allocation4 + $0x1], 0  ;;  %s820_s15 = smov 0   ;;  %s822_s16 = smov 0  }
   0x5   :  { %s824_s17 = smov 0   ;;  %s826_s18 = smov 0  }
   0x6 LB: > { %s841_s19 = sadd.s32 4294967295, %s783_s18   ;;  %s539_s20 = sadd.s32 4294967294, %s783_s18   ;;  %s783_s18 = sphi %s826_s18, %s1078_s18   ;;  %s779_s17 = sphi %s824_s17, %s1077_s17   ;;  %s775_s16 = sphi %s822_s16, %s1076_s16   ;;  %s771_s15 = sphi %s820_s15, %s1075_s15  }
   0x7   : > { %p41_p0 = scmp.ne.s32.totalorder %s775_s16, %s771_s15  ;;  %p1059_p1 = scmp.eq.s32.totalorder %s841_s19, 0 }
   0x8   : > { %p134_p3 = scmp.eq.s32.totalorder %s539_s20, 1  ;;  %p540_p5 = scmp.ge.s32.totalorder %s783_s18, 1 }
   0x9   : > { %p850_p4 = por %p1059_p1, %p41_p0  ;;  %p141_p7 = scmp.lt.s32.totalorder %s783_s18, 3 }
   0xa   : > { %p855_p6 = por %p134_p3, %p41_p0  ;;  %s785_s24 = smov [#allocation5]  }
   0xb   : > { %s1062_s21 = scalar_select %p850_p4, 1, 0 }
   0xc   : > { %s1063_s22 = scalar_select %p855_p6, 1, 0 }
   0xd   : > { %p860_p8 = pnand %p540_p5, %p141_p7  ;;  %s153_s25 = sshll.u32 %s785_s24, 4  ;;  %s864_s25 = int_to_ptr.vmem [resolvable:$true] %s153_s25 }
   0xe   : > { %s876_s27 = sadd.s32 1, %s783_s18   ;;  %s28_s28 = sadd.s32 1, %s779_s17 }
   0xf   : > { %s1064_s23 = scalar_select %p860_p8, 1, 0 }
  0x10   : > { %p591_p9 = pneg %p860_p8  ;;  %s25_s29 = ssub.s32 %s783_s18, %s876_s27 }
  0x11   : > { %s655_s6 = scalar_lea.hbm %s1055_s1, 512 }
  0x12   : > { %p871_p11 = pnand %p591_p9, %p1059_p1  ;;  %p656_p12 = scmp.ne.s32.totalorder %s1055_s1, %s655_s6 }
  0x13   : > { %p662_p5 = scmp.lt.u32.totalorder %s655_s6, %s1055_s1 }
  0x14   : > { %p657_p13 = pneg %p871_p11 }
  0x16   : > { %p658_p0 = pnand %p657_p13, %p656_p12 }
  0x18   : > { %p659_p3 = pneg %p658_p0 }
  0x1a   : > { %p664_p7 = pnand %p662_p5, %p659_p3 }
  0x1c   : > { %667 = shalt.err (!%p664_p7)
}
  0x1d   : > { %s668_s11 = scalar_lea.vmem %s864_s25, 512  ;;  %p676_p2 = scmp.lt.s32.totalorder %s864_s25, %s864_s25 }
  0x1e   : > { %p669_p9 = scmp.ne.s32.totalorder %s864_s25, %s668_s11  ;;  %p677_p6 = scmp.lt.s32.totalorder %s668_s11, %s668_s11 }
  0x20   : > { %p671_p10 = pnand %p669_p9, %p657_p13  ;;  %p678_p4 = por %p677_p6, %p676_p2 }
  0x22   : > { %p672_p1 = pneg %p671_p10 }
  0x24   : > { %p679_p8 = pnand %p678_p4, %p672_p1 }
  0x26   : > { %682 = shalt.err (!%p679_p8)
}
  0x27   : > { %s786_s12 = smov 128   ;;  %s787_s13 = smov 8  }
  0x28   : > { %594 = dma.hbm_to_vmem [thread:$0]  (!%p871_p11), %s1055_s1, 512, %s864_s25, [#allocation6], %s786_s12, %s786_s12, %s787_s13  }
  0x29   : > { %p26_p2 = scmp.eq.s32.totalorder %s25_s29, 0  ;;  %p35_p1 = scmp.ne.s32.totalorder %s779_s17, %s775_s16 }
  0x2a   : > { %p36_p4 = scmp.eq.s32.totalorder %s783_s18, 0  ;;  %p604_p6 = scmp.lt.s32.totalorder %s783_s18, 2 }
  0x2b   : > { %s907_s24 = scalar_select %p26_p2, %s779_s17, %s28_s28  }
  0x2c   : > { %p37_p8 = por %p36_p4, %p35_p1  ;;  %p1066_p10 = scmp.eq.s32.totalorder %s841_s19, 1 }
  0x2d   : > { %s173_s5 = sand.u32 1, %s779_s17   ;;  %s544_s6 = sshll.u32 %s783_s18, 7 }
  0x2e   : > { %p911_p12 = por %p1066_p10, %p35_p1  ;;  %s543_s7 = sshll.u32 %s173_s5, 3 }
  0x2f   : > { %s920_s9 = scalar_lea.hbm %s1054_s0, %s544_s6  ;;  %s177_s25 = scalar_lea.vmem [#allocation2], %s543_s7 }
  0x30   : > { %s184_s28 = sshll.u32 %s177_s25, 4  ;;  %p922_p11 = pnand %p604_p6, %p37_p8  ;;  %s926_s28 = int_to_ptr.vmem [resolvable:$true] %s184_s28 }
  0x31   : > { %s174_s10 = scalar_lea.sflag [#allocation3], %s173_s5  ;;  %s683_s11 = scalar_lea.hbm %s920_s9, 128 }
  0x32   : > { %p684_p13 = scmp.ne.s32.totalorder %s920_s9, %s683_s11  ;;  %p685_p0 = pneg %p922_p11 }
  0x33   : > { %s688_s14 = scalar_lea.hbm %s1054_s0, 256  ;;  %p689_p7 = scmp.lt.u32.totalorder %s920_s9, %s1054_s0 }
  0x34   : > { %p686_p3 = pnand %p685_p0, %p684_p13  ;;  %p690_p9 = scmp.lt.u32.totalorder %s688_s14, %s683_s11 }
  0x35   : > { %p692_p1 = scmp.lt.u32.totalorder %s683_s11, %s920_s9 }
  0x36   : > { %p687_p5 = pneg %p686_p3  ;;  %p691_p2 = por %p690_p9, %p689_p7 }
  0x38   : > { %p693_p4 = por %p692_p1, %p691_p2 }
  0x3a   : > { %p694_p6 = pnand %p693_p4, %p687_p5 }
  0x3c   : > { %697 = shalt.err (!%p694_p6)
}
  0x3d   : > { %s698_s5 = scalar_lea.vmem %s926_s28, 128  ;;  %s788_s7 = smov [#allocation2]  }
  0x3e   : > { %p699_p8 = scmp.ne.s32.totalorder %s926_s28, %s698_s5  ;;  %s703_s26 = sshll.u32 %s788_s7, 4  ;;  %s704_s26 = int_to_ptr.vmem [resolvable:$false] %s703_s26 }
  0x3f   : > { %s705_s8 = scalar_lea.vmem %s704_s26, 256  ;;  %p706_p3 = scmp.lt.s32.totalorder %s926_s28, %s704_s26 }
  0x40   : > { %p701_p10 = pnand %p699_p8, %p685_p0  ;;  %p707_p7 = scmp.lt.s32.totalorder %s705_s8, %s698_s5 }
  0x42   : > { %p702_p13 = pneg %p701_p10  ;;  %p708_p9 = por %p707_p7, %p706_p3 }
  0x44   : > { %p709_p2 = pnand %p708_p9, %p702_p13 }
  0x46   : > { %712 = shalt.err (!%p709_p2)
}
  0x47   : > { %598 = dma.hbm_to_vmem [thread:$0]  (!%p922_p11), %s920_s9, 128, %s926_s28, %s174_s10  }
  0x48   : > { %p1069_p5 = scmp.ne.s32.totalorder %s1064_s23, 0 }
  0x49   : > { %s956_s25 = sand.u32 (!%p1069_p5), 1, %s775_s16   ;;  %p1070_p0 = scmp.ne.s32.totalorder (!%p1069_p5), %s1062_s21, 0 }
  0x4a   : > { %193 = sbr.rel (%p1069_p5) target bundleno = 1024 (0x400), region = 36  ;;  %s546_s11 = sshll.u32 (!%p1069_p5), %s956_s25, 3 }
  0x4b   : > { %s196_s12 = scalar_lea.sflag (!%p1069_p5), [#allocation3], %s956_s25  ;;  %s199_s13 = scalar_lea.vmem (!%p1069_p5), [#allocation2], %s546_s11 }
  0x51   : > { %758 = dma.done.wait (%p1070_p0), %s196_s12, 128  }
  0x52   : > { %760 = vsyncadd (%p1070_p0), %s196_s12, 4294967168  ;;  %p1071_p11 = scmp.eq.s32.totalorder %s841_s19, 0 }
  0x54   : > { %762 = dma.done.wait (%p1071_p11), [#allocation6], 512   ;;  %p1072_p1 = pmov %p1071_p11 }
  0x55   : > { %vm235_vm0 = vcmask 261120   ;;  %v234_v0 = vld [vmem:[%s199_s13] sm:$0xff]  ;;  %v262_v4 = vld [vmem:[#allocation5] sm:$0xff]  ;;  %v263_v5 = vld [vmem:[#allocation5 + $0x8] sm:$0xff]  ;;  %v789_v7 = vmov 0.0|0.0   ;;  %vm790_vm1 = vmmov 0  }
  0x56   : > { %764 = vsyncadd (%p1072_p1), [#allocation6], 4294966784  ;;  %v236_v1 = vsel %vm235_vm0, %v234_v0, 0.0  ;;  %v239_v2 = vmul.f32 %v234_v0, %v234_v0  ;;  %v264_v6 = vld [vmem:[#allocation5 + $0x10] sm:$0xff]  ;;  %577 = vmatprep.subr.bf16.mxu0 %v789_v7  ;;  %v578_v8 = vpack.c.bf16 %v263_v5, %v262_v4  ;;  %v265_v9 = vld [vmem:[#allocation5 + $0x18] sm:$0xff]  ;;  %v791_v10 = vmov 0.0  }
  0x57   : > { %237 = vadd.xlane.f32.xlu0 %v236_v1  ;;  %574 = vmatprep.mubr.msk.f32.mxu0 %vm790_vm1, %v791_v10  ;;  %v581_v11 = vpack.c.bf16 %v265_v9, %v264_v6  ;;  %v553_v12 = vld [vmem:[%s1057_s3] ss:$0 sm:$0xff]  ;;  %s792_s9 = smov 32   ;;  %v554_v13 = vld [vmem:[%s1057_s3 + $0x1] ss:$0 sm:$0xff]  ;;  %s793_s26 = smov 96  }
  0x58   : > { %v240_v3 = vsel %vm235_vm0, %v239_v2, 0.0  ;;  %579 = vmatpush3.bf16.msra.mxu0 %v578_v8  ;;  %351 = vrot.lane.b32.xlu1 %v553_v12, %s792_s9  ;;  %v549_v23 = vld [vmem:[%s1057_s3 + $0x2] ss:$0 sm:$0xff]  ;;  %v550_v25 = vld [vmem:[%s1057_s3 + $0x3] ss:$0 sm:$0xff]  ;;  %s227_s23 = scalar_lea.vmem [#allocation7], %s546_s11 }
  0x59   : > { %580 = vmatprep.subr.bf16.mxu0 %v789_v7  ;;  %v551_v30 = vld [vmem:[%s1056_s2] ss:$0 sm:$0xff]  ;;  %v555_v52 = vld [vmem:[%s1057_s3 + $0x4] ss:$0 sm:$0xff]  ;;  %v556_v57 = vld [vmem:[%s1057_s3 + $0x5] ss:$0 sm:$0xff] }
  0x5a   : > { %s459_s28 = sshll.u32 %s227_s23, 4  ;;  %vm443_vm2 = vcmask 523520   ;;  %s446_s14 = scalar_lea.sflag [#allocation4], %s956_s25  ;;  %s1012_s28 = int_to_ptr.vmem [resolvable:$true] %s459_s28 }
  0x5b   : > { %241 = vadd.xlane.f32.xlu0 %v240_v3  ;;  %s713_s20 = scalar_lea.vmem %s1012_s28, 128 }
  0x5c   : > { %582 = vmatpush3.bf16.msra.mxu0 %v581_v11  ;;  %365 = vrot.lane.b32.xlu1 %v554_v13, %s792_s9  ;;  %p714_p4 = scmp.ne.s32.totalorder %s1012_s28, %s713_s20 }
  0x5e   : > { %p715_p6 = pnand %p714_p4, %p911_p12 }
  0x60   : > { %p716_p8 = pneg %p715_p6 }
  0xca   : > { %v352_v29 = vpop.permute.xlu1 %351 }
  0xce   : > { %v366_v32 = vpop.permute.xlu1 %365 }
  0xe4   : > { %v238_v14 = vpop.xlane.xlu0 %237 }
  0xe5   : > { %v243_v15 = vmul.f32 0.03125, %v238_v14 }
  0xe7   : > { %v245_v17 = vmul.f32 %v243_v15, %v243_v15  ;;  %v247_v21 = vsub.f32 %v234_v0, %v243_v15 }
  0xe8   : > { %v242_v16 = vpop.xlane.xlu0 %241 }
  0xe9   : > { %v244_v18 = vmul.f32 0.03125, %v242_v16 }
  0xeb   : > { %v246_v19 = vsub.f32 %v244_v18, %v245_v17 }
  0xed   : > { %v248_v20 = vadd.f32 1e-05, %v246_v19 }
  0xef   : > { %647 = vrsqrt.f32 %v248_v20 }
  0xf9   : > { %v648_v22 = vpop.eup %647 }
  0xfa   : > { %v250_v24 = vmul.f32 %v648_v22, %v247_v21 }
  0xfc   : > { %v255_v26 = vmul.f32 %v549_v23, %v250_v24 }
  0xfe   : > { %v260_v27 = vadd.f32 %v550_v25, %v255_v26 }
 0x100   : > { %v261_v28 = vmul.f32 0.01, %v260_v27 }
 0x102   : > { %575 = vmatmul.mubr.msk.f32.vlgmr.msra.gmra.mrb[0].mxu0 %vm235_vm0, %v261_v28 }
 0x1d5   : > { %v342_v31 = vpop.f32.mrb[0].mxu0 }
 0x1d6   : > { %v343_v33 = vadd.f32 %v551_v30, %v342_v31  ;;  %v576_v34 = vpop.f32.mrb[1].mxu0 }
 0x1d8   : > { %v368_v35 = vmul.f32 %v366_v32, %v343_v33  ;;  %v354_v36 = vmul.f32 %v352_v29, %v343_v33 }
 0x1da   : > { %v370_v37 = vmul.f32 %v368_v35, %v368_v35  ;;  %356 = vrot.lane.b32.xlu0 %v354_v36, %s793_s26 }
 0x1dc   : > { %372 = vrot.lane.b32.xlu1 %v370_v37, %s793_s26 }
 0x24c   : > { %v357_v38 = vpop.permute.xlu0 %356 }
 0x24d   : > { %v359_v39 = vadd.f32 %v357_v38, %v343_v33 }
 0x24e   : > { %v373_v41 = vpop.permute.xlu1 %372 }
 0x24f   : > { %v369_v40 = vmul.f32 %v359_v39, %v359_v39 }
 0x251   : > { %v375_v42 = vadd.f32 %v373_v41, %v369_v40 }
 0x253   : > { %v376_v43 = vadd.f32 1e-08, %v375_v42 }
 0x255   : > { %649 = vrsqrt.f32 %v376_v43 }
 0x25f   : > { %v650_v44 = vpop.eup %649 }
 0x260   : > { %380 = vrot.lane.b32.xlu1 %v650_v44, %s792_s9  ;;  %v378_v45 = vmul.f32 %v650_v44, %v359_v39 }
 0x262   : > { %v384_v49 = vsel %vm235_vm0, %v378_v45, 0.0  ;;  %v387_v50 = vmul.f32 %v378_v45, %v378_v45 }
 0x264   : > { %v388_v51 = vsel %vm235_vm0, %v387_v50, 0.0 }
 0x2d2   : > { %v381_v46 = vpop.permute.xlu1 %380 }
 0x2d3   : > { %v383_v47 = vmul.f32 %v381_v46, %v368_v35 }
 0x2d5   : > { %411 = vrot.lane.b32.xlu1 %v383_v47, %s793_s26  ;;  %v417_v48 = vmul.f32 %v383_v47, %v383_v47 }
 0x2d9   : > { %419 = vrot.lane.b32.xlu1 %v417_v48, %s793_s26 }
 0x2fd   : > { %385 = vadd.xlane.f32.xlu1 %v384_v49 }
 0x301   : > { %389 = vadd.xlane.f32.xlu1 %v388_v51 }
 0x312   : > { %434 = vrot.lane.b32.xlu1 %v555_v52, %s792_s9 }
 0x347   : > { %v412_v53 = vpop.permute.xlu1 %411 }
 0x348   : > { %v414_v54 = vsel %vm235_vm0, %v412_v53, 0.0 }
 0x349   : > { %415 = vadd.xlane.f32.xlu0 %v414_v54 }
 0x34b   : > { %v420_v55 = vpop.permute.xlu1 %419 }
 0x34c   : > { %v422_v56 = vsel %vm235_vm0, %v420_v55, 0.0 }
 0x34d   : > { %423 = vadd.xlane.f32.xlu0 %v422_v56 }
 0x363   : > { %439 = vrot.lane.b32.xlu0 %v556_v57, %s792_s9  ;;  %s558_s9 = sshll.u32 %s841_s19, 7  ;;  %s794_s19 = smov [#allocation7]  }
 0x364   : > { %s1010_s10 = scalar_lea.hbm %s1058_s4, %s558_s9  ;;  %s717_s6 = sshll.u32 %s794_s19, 4  ;;  %s718_s6 = int_to_ptr.vmem [resolvable:$false] %s717_s6 }
 0x365   : > { %s719_s5 = scalar_lea.vmem %s718_s6, 256  ;;  %p720_p10 = scmp.lt.s32.totalorder %s1012_s28, %s718_s6 }
 0x366   : > { %p721_p13 = scmp.lt.s32.totalorder %s719_s5, %s713_s20 }
 0x368   : > { %p722_p3 = por %p721_p13, %p720_p10 }
 0x36a   : > { %p723_p7 = pnand %p722_p3, %p716_p8 }
 0x38a   : > { %v386_v58 = vpop.xlane.xlu1 %385 }
 0x38b   : > { %v391_v59 = vmul.f32 0.03125, %v386_v58 }
 0x38d   : > { %v393_v61 = vmul.f32 %v391_v59, %v391_v59  ;;  %v395_v1 = vsub.f32 %v378_v45, %v391_v59 }
 0x38e   : > { %v390_v60 = vpop.xlane.xlu1 %389 }
 0x38f   : > { %v392_v62 = vmul.f32 0.03125, %v390_v60 }
 0x391   : > { %v394_v63 = vsub.f32 %v392_v62, %v393_v61 }
 0x392   : > { %v435_v15 = vpop.permute.xlu1 %434 }
 0x393   : > { %v396_v0 = vadd.f32 1e-05, %v394_v63 }
 0x395   : > { %651 = vrsqrt.f32 %v396_v0 }
 0x39f   : > { %v652_v2 = vpop.eup %651 }
 0x3a0   : > { %v398_v3 = vmul.f32 %v652_v2, %v395_v1 }
 0x3a2   : > { %v403_v4 = vmul.f32 %v555_v52, %v398_v3 }
 0x3a4   : > { %v408_v5 = vadd.f32 %v556_v57, %v403_v4 }
 0x3a6   : > { %409 = vst.msk [vmem:[%s227_s23] sm:$0xff] %vm235_vm0, %v408_v5 }
 0x3d6   : > { %v416_v6 = vpop.xlane.xlu0 %415 }
 0x3d7   : > { %v425_v7 = vmul.f32 0.03125, %v416_v6 }
 0x3d9   : > { %v427_v9 = vmul.f32 %v425_v7, %v425_v7  ;;  %v429_v13 = vsub.f32 %v383_v47, %v425_v7 }
 0x3da   : > { %v424_v8 = vpop.xlane.xlu0 %423 }
 0x3db   : > { %v426_v10 = vmul.f32 0.03125, %v424_v8 }
 0x3dd   : > { %v428_v11 = vsub.f32 %v426_v10, %v427_v9 }
 0x3de   : > { %v440_v17 = vpop.permute.xlu0 %439 }
 0x3df   : > { %v430_v12 = vadd.f32 1e-05, %v428_v11 }
 0x3e1   : > { %653 = vrsqrt.f32 %v430_v12 }
 0x3eb   : > { %v654_v14 = vpop.eup %653 }
 0x3ec   : > { %v432_v16 = vmul.f32 %v654_v14, %v429_v13 }
 0x3ee   : > { %v437_v18 = vmul.f32 %v435_v15, %v432_v16 }
 0x3f0   : > { %v442_v19 = vadd.f32 %v440_v17, %v437_v18 }
 0x3f2   : > { %444 = vst.msk [vmem:[%s227_s23] sm:$0xff] %vm443_vm2, %v442_v19 }
 0x3f3   : > { %726 = shalt.err (!%p723_p7)
}
 0x3f4   : > { %s727_s25 = scalar_lea.hbm %s1010_s10, 128  ;;  %s731_s8 = scalar_lea.hbm %s1058_s4, 256 }
 0x3f5   : > { %p728_p9 = scmp.ne.s32.totalorder %s1010_s10, %s727_s25  ;;  %p732_p0 = scmp.lt.u32.totalorder %s1010_s10, %s1058_s4 }
 0x3f6   : > { %p733_p11 = scmp.lt.u32.totalorder %s731_s8, %s727_s25  ;;  %p735_p4 = scmp.lt.u32.totalorder %s727_s25, %s1010_s10 }
 0x3f7   : > { %p729_p2 = pnand %p728_p9, %p911_p12 }
 0x3f8   : > { %p734_p1 = por %p733_p11, %p732_p0 }
 0x3f9   : > { %p730_p5 = pneg %p729_p2 }
 0x3fa   : > { %p736_p6 = por %p735_p4, %p734_p1 }
 0x3fc   : > { %p737_p8 = pnand %p736_p6, %p730_p5 }
 0x3fe   : > { %740 = shalt.err (!%p737_p8)
}
 0x3ff   : > { %589 = dma.vmem_to_hbm [thread:$0]  (%p911_p12), %s1012_s28, 128, %s1010_s10, %s446_s14  }
 0x400 PF: > { %s471_s21 = sand.u32 1, %s771_s15   ;;  %p1073_p10 = scmp.ne.s32.totalorder %s1063_s22, 0 }
 0x401   : > { %p1074_p13 = scmp.ge.s32.totalorder %s783_s18, 2  ;;  %s472_s23 = scalar_lea.sflag [#allocation4], %s471_s21 }
 0x403   : > { %p600_p3 = pnand %p1074_p13, %p1073_p10 }
 0x405   : > { %766 = dma.done.wait (!%p600_p3), %s472_s23, 128  }
 0x406   : > { %768 = vsyncadd (!%p600_p3), %s472_s23, 4294967168  ;;  %p18_p7 = scmp.ge.s32.totalorder %s876_s27, 4   ;;  %s1075_s15 = smov %s775_s16 }
 0x407   : > { %s1076_s16 = smov %s779_s17  ;;  %s1077_s17 = smov %s907_s24 }
 0x408   : > { %s1078_s18 = smov %s876_s27  ;;  %20 = sbr.rel (!%p18_p7) target bundleno = 6 (0x6), region = 85 }
 0x40f   :  { %477 = vsyncpa [#allocation3], 1 }
 0x410   :  { %479 = vsyncpa [#allocation3 + $0x1], 1 }
 0x411   :  { %480 = vsyncpa [#allocation6], 1 }
 0x412   :  { %481 = vsyncpa [#allocation4], 1 }
 0x413   :  { %483 = vsyncpa [#allocation4 + $0x1], 1 }

</bundles_post_ra>
